<compile_context>
chip_gen: v7x
topology: tpu7x:2x2x1
jax: 0.10.0
libtpu: 0.0.40
codegen_flags: <defaults>
</compile_context>

<pallas_src>
import jax
import jax.numpy as jnp
import numpy as np
from jax.experimental import pallas as pl
from jax.experimental.pallas import tpu as pltpu


def _round_up(x, m):
    return ((x + m - 1) // m) * m


def gaussian_nonde_kernel(x_ref, r_ref, p_ref, o_ref):
    # x_ref: (TB, CIN)   natural-layout x rows, CIN = V*fold, f32 (read once)
    # r_ref: (CIN, COUT) bf16 0/1 selection matrix, R[a, b] = (a == src_col(b))
    # p_ref: (2, COUT)   row 0 = |anchor_means| (flattened, fold-tiled)
    #                    row 1 = -0.5 / (|anchor_var| + 0.5)^2
    # o_ref: (TB, COUT)  COUT = V*K*fold (lane-dense, multiple of 128 when folded)
    x = x_ref[...]

    # Exact 3-way split of x into non-overlapping bf16 pieces: each piece times
    # the 0/1 matrix is exact on the bf16 MXU, and the pieces sum back to x in
    # f32, so the lane fan-out below reproduces x bit-exactly.
    x1 = x.astype(jnp.bfloat16)
    r1 = x - x1.astype(jnp.float32)
    x2 = r1.astype(jnp.bfloat16)
    x3 = (r1 - x2.astype(jnp.float32)).astype(jnp.bfloat16)

    r = r_ref[...]
    # Lane fan-out x[b, v] -> xr[b, v*K + k] on the (otherwise idle) MXU.
    xr = jnp.dot(x1, r, preferred_element_type=jnp.float32)
    xr = xr + jnp.dot(x2, r, preferred_element_type=jnp.float32)
    xr = xr + jnp.dot(x3, r, preferred_element_type=jnp.float32)

    m = p_ref[0:1, :]                          # (1, COUT) broadcast over rows
    c = p_ref[1:2, :]
    d = xr - m
    # Hot path per element: sub, mul, mul (VPU) + exp (EUP). No per-elem divide.
    o_ref[...] = jnp.exp(c * (d * d)).astype(o_ref.dtype)


def gaussian_nonde_layer(x, anchor_means, anchor_var, *,
                         out_dtype=jnp.float32,
                         block_out_bytes=1 << 20):
    """Pallas forward for GaussianNondeLayer. x: (B, V) -> (B, V*K)."""
    B, V = x.shape
    Vp, K = anchor_means.shape
    assert Vp == V, (Vp, V)
    L = V * K

    # ---- per-anchor coefficients: O(V*K) wrapper work, not O(B*V*K) ----
    m_flat = jnp.abs(anchor_means).astype(jnp.float32).reshape(1, L)
    std = jnp.abs(anchor_var).astype(jnp.float32) + 0.5
    c_flat = (-0.5 / (std * std)).reshape(1, L)

    # ---- lane folding: make the output lane dim a full 128-lane multiple ----
    fold = 1
    if L < 128 and 128 % L == 0:
        fold = 128 // L
    cin, cout = V * fold, L * fold

    # Pad batch up to a multiple of `fold` instead of regressing to narrow
    # (masked-store) output blocks.
    b_pad = _round_up(B, fold)
    xp = x.astype(jnp.float32)
    if b_pad != B:
        xp = jnp.pad(xp, ((0, b_pad - B), (0, 0)))
    rows = b_pad // fold
    x2d = xp.reshape(rows, cin)                     # free row-major regroup

    if fold > 1:
        m_flat = jnp.tile(m_flat, (1, fold))
        c_flat = jnp.tile(c_flat, (1, fold))
    params = jnp.concatenate([m_flat, c_flat], axis=0)          # (2, cout)

    # 0/1 selection matrix: output column b reads input column
    # (b // L) * V + (b % L) // K.  Values 0/1 are exact in bf16.
    # NOTE: assumes V*K is modest (R is (V*fold, V*K*fold)); for very large V*K
    # the grid should also be split over column groups.
    # TODO(synk): add a column-group grid axis for very large V*K.
    b_idx = jnp.arange(cout)
    src = (b_idx // L) * V + (b_idx % L) // K
    repl = (jnp.arange(cin)[:, None] == src[None, :]).astype(jnp.bfloat16)

    # ---- row tiling: ~1 MiB output blocks, but always >= 2 grid steps so the
    # "parallel" axis can feed both TensorCores on v7x ----
    tb_target = max(8, block_out_bytes // (4 * cout))
    n_blocks = max(2, pl.cdiv(rows, tb_target))
    tb = min(_round_up(pl.cdiv(rows, n_blocks), 8), _round_up(rows, 8))
    rows_pad = _round_up(rows, tb)
    if rows_pad != rows:
        x2d = jnp.pad(x2d, ((0, rows_pad - rows), (0, 0)))
    grid = (rows_pad // tb,)

    out_itemsize = jnp.dtype(out_dtype).itemsize
    block_bytes = tb * cin * 4 + tb * cout * out_itemsize
    # Double-buffered in+out blocks + params/repl + elementwise temporaries.
    vmem_limit = int(min(100 << 20, max(32 << 20, 6 * block_bytes)))

    out2d = pl.pallas_call(
        gaussian_nonde_kernel,
        out_shape=jax.ShapeDtypeStruct((rows_pad, cout), out_dtype),
        grid=grid,
        in_specs=[
            pl.BlockSpec((tb, cin), lambda i: (i, 0)),      # x: tiled over rows
            pl.BlockSpec((cin, cout), lambda i: (0, 0)),    # repl: resident
            pl.BlockSpec((2, cout), lambda i: (0, 0)),      # params: resident
        ],
        out_specs=pl.BlockSpec((tb, cout), lambda i: (i, 0)),
        compiler_params=pltpu.CompilerParams(
            dimension_semantics=("parallel",),              # megacore / dual-TC
            vmem_limit_bytes=vmem_limit,
        ),
        cost_estimate=pl.CostEstimate(
            flops=3 * rows_pad * cout + 6 * rows_pad * cin * cout,
            transcendentals=rows_pad * cout,
            bytes_accessed=4 * rows_pad * cin + out_itemsize * rows_pad * cout
            + 2 * cin * cout + 8 * cout,
        ),
    )(x2d, repl, params)

    # flatten(1, 2): contiguous regroup back to (B, V*K) — free when unpadded.
    out = out2d[:rows] if rows_pad != rows else out2d
    out = out.reshape(b_pad, L)
    if b_pad != B:
        out = out[:B]
    return out


def make_params(num_vec, K=4, dtype=jnp.float32):
    """Deterministic parameter init mirroring the PyTorch __init__."""
    anchor_means = jnp.broadcast_to(
        jnp.linspace(0.0, 20.0, K, dtype=dtype)[None, :], (num_vec, K)
    )
    anchor_var = jnp.full((num_vec, K), 20.0 / (K / 2.0), dtype=dtype)
    return anchor_means, anchor_var


def reference_forward(x, anchor_means, anchor_var):
    """Pure-JAX reference matching the PyTorch forward."""
    mean = jnp.abs(anchor_means)[None]          # (1, V, K)
    std = jnp.abs(anchor_var)[None] + 0.5       # (1, V, K)
    g = jnp.exp(-0.5 * ((x[..., None] - mean) / std) ** 2)
    return g.reshape(x.shape[0], -1)


if __name__ == "__main__":
    fwd = jax.jit(gaussian_nonde_layer)
    key = jax.random.PRNGKey(0)

    # Case 1: small but pipeline-exercising shape (fold=2 -> 128 lanes, grid=2).
    B, num_vec, K = 512, 16, 4
    anchor_means, anchor_var = make_params(num_vec, K)
    x = jax.random.normal(key, (B, num_vec), dtype=jnp.float32) * 5.0 + 10.0
    out = jax.block_until_ready(fwd(x, anchor_means, anchor_var))
    ref = reference_forward(x, anchor_means, anchor_var)
    assert out.shape == (B, num_vec * K), out.shape
    np.testing.assert_allclose(np.asarray(out), np.asarray(ref),
                               rtol=1e-5, atol=1e-6)

    # Case 2: odd batch -> exercises the fold / row padding fallback path.
    B2 = 37
    x2 = jax.random.normal(jax.random.PRNGKey(1), (B2, num_vec),
                           dtype=jnp.float32) * 5.0 + 10.0
    out2 = jax.block_until_ready(fwd(x2, anchor_means, anchor_var))
    ref2 = reference_forward(x2, anchor_means, anchor_var)
    assert out2.shape == (B2, num_vec * K), out2.shape
    np.testing.assert_allclose(np.asarray(out2), np.asarray(ref2),
                               rtol=1e-5, atol=1e-6)

    print("KERNEL_OK")
</pallas_src>

<mosaic_0001>
module attributes {stable_mosaic.version = 11 : i64} {
  func.func @gaussian_nonde_kernel(%arg0: i32, %arg1: memref<128x32xf32, #tpu.memory_space<vmem>>, %arg2: memref<32x128xbf16, #tpu.memory_space<vmem>>, %arg3: memref<2x128xf32, #tpu.memory_space<vmem>>, %arg4: memref<128x128xf32, #tpu.memory_space<vmem>>) attributes {dimension_semantics = [#tpu.dimension_semantics<parallel>], iteration_bounds = array<i64: 2>, scalar_prefetch = 0 : i64, scratch_operands = 0 : i64, tpu.core_type = #tpu.core_type<tc>, window_params = [{transform_indices = @transform_0, window_bounds = array<i64: 128, 32>}, {pipeline_mode = #tpu.pipeline_mode<synchronous>, transform_indices = @transform_1, window_bounds = array<i64: 32, 128>}, {pipeline_mode = #tpu.pipeline_mode<synchronous>, transform_indices = @transform_2, window_bounds = array<i64: 2, 128>}, {transform_indices = @transform_3, window_bounds = array<i64: 128, 128>}]} {
    %c0 = arith.constant 0 : index
    %c0_0 = arith.constant 0 : index
    %0 = vector.load %arg1[%c0, %c0_0] : memref<128x32xf32, #tpu.memory_space<vmem>>, vector<128x32xf32>
    %1 = arith.truncf %0 : vector<128x32xf32> to vector<128x32xbf16>
    %2 = arith.extf %1 : vector<128x32xbf16> to vector<128x32xf32>
    %3 = arith.subf %0, %2 : vector<128x32xf32>
    %4 = arith.truncf %3 : vector<128x32xf32> to vector<128x32xbf16>
    %5 = arith.extf %4 : vector<128x32xbf16> to vector<128x32xf32>
    %6 = arith.subf %3, %5 : vector<128x32xf32>
    %7 = arith.truncf %6 : vector<128x32xf32> to vector<128x32xbf16>
    %c0_1 = arith.constant 0 : index
    %c0_2 = arith.constant 0 : index
    %8 = vector.load %arg2[%c0_1, %c0_2] : memref<32x128xbf16, #tpu.memory_space<vmem>>, vector<32x128xbf16>
    %cst = arith.constant dense<0.000000e+00> : vector<128x128xf32>
    %9 = tpu.matmul %1, %8, %cst {dimension_numbers = #tpu.dot_dimension_numbers<[1], [0], [0], [1], [0, 0, 1, 1], [], []>} : vector<128x32xbf16>, vector<32x128xbf16>, vector<128x128xf32> -> vector<128x128xf32>
    %cst_3 = arith.constant dense<0.000000e+00> : vector<128x128xf32>
    %10 = tpu.matmul %4, %8, %cst_3 {dimension_numbers = #tpu.dot_dimension_numbers<[1], [0], [0], [1], [0, 0, 1, 1], [], []>} : vector<128x32xbf16>, vector<32x128xbf16>, vector<128x128xf32> -> vector<128x128xf32>
    %11 = arith.addf %9, %10 : vector<128x128xf32>
    %cst_4 = arith.constant dense<0.000000e+00> : vector<128x128xf32>
    %12 = tpu.matmul %7, %8, %cst_4 {dimension_numbers = #tpu.dot_dimension_numbers<[1], [0], [0], [1], [0, 0, 1, 1], [], []>} : vector<128x32xbf16>, vector<32x128xbf16>, vector<128x128xf32> -> vector<128x128xf32>
    %13 = arith.addf %11, %12 : vector<128x128xf32>
    %c0_5 = arith.constant 0 : index
    %c0_6 = arith.constant 0 : index
    %14 = vector.load %arg3[%c0_5, %c0_6] : memref<2x128xf32, #tpu.memory_space<vmem>>, vector<1x128xf32>
    %c1 = arith.constant 1 : index
    %c0_7 = arith.constant 0 : index
    %15 = vector.load %arg3[%c1, %c0_7] : memref<2x128xf32, #tpu.memory_space<vmem>>, vector<1x128xf32>
    %16 = vector.broadcast %14 : vector<1x128xf32> to vector<128x128xf32>
    %17 = arith.subf %13, %16 : vector<128x128xf32>
    %18 = arith.mulf %17, %17 : vector<128x128xf32>
    %19 = vector.broadcast %15 : vector<1x128xf32> to vector<128x128xf32>
    %20 = arith.mulf %19, %18 : vector<128x128xf32>
    %21 = math.exp %20 : vector<128x128xf32>
    %c0_8 = arith.constant 0 : index
    %c0_9 = arith.constant 0 : index
    %22 = vector.load %arg4[%c0_8, %c0_9] : memref<128x128xf32, #tpu.memory_space<vmem>>, vector<128x128xf32>
    tpu.vector_store %arg4[%c0_8, %c0_9], %21 {strides = array<i32>} : memref<128x128xf32, #tpu.memory_space<vmem>>, vector<128x128xf32>,
    return
  }
  func.func @transform_0(%arg0: i32) -> (i32, i32) {
    %c0_i32 = arith.constant 0 : i32
    %c0_i32_0 = arith.constant 0 : i32
    return %arg0, %c0_i32 : i32, i32
  }
  func.func @transform_1(%arg0: i32) -> (i32, i32) {
    %c0_i32 = arith.constant 0 : i32
    %c0_i32_0 = arith.constant 0 : i32
    %c0_i32_1 = arith.constant 0 : i32
    return %c0_i32, %c0_i32_0 : i32, i32
  }
  func.func @transform_2(%arg0: i32) -> (i32, i32) {
    %c0_i32 = arith.constant 0 : i32
    %c0_i32_0 = arith.constant 0 : i32
    %c0_i32_1 = arith.constant 0 : i32
    return %c0_i32, %c0_i32_0 : i32, i32
  }
  func.func @transform_3(%arg0: i32) -> (i32, i32) {
    %c0_i32 = arith.constant 0 : i32
    %c0_i32_0 = arith.constant 0 : i32
    return %arg0, %c0_i32 : i32, i32
  }
}

</mosaic_0001>

<bundles_post_ra>
// kernel: gaussian_nonde_layer.1
= control target key start
LH: loop header
LB: loop body
LE: loop exit
PB: predicated region body
PF: predicated region fallthrough
CT: control target
= control target key end

     0   :  { %s1072_s12 = smov 0   ;;  %s1239_s0 = inlined_call_operand.vmem [shape: f32[256,32], index: 0, kind: input, shape index: {}]   ;;  %s1240_s1 = inlined_call_operand.vmem [shape: bf16[32,128], index: 1, kind: input, shape index: {}]   ;;  %s1241_s2 = inlined_call_operand.vmem [shape: f32[2,128], index: 2, kind: input, shape index: {}]   ;;  %s1242_s3 = inlined_call_operand.vmem [shape: f32[256,128], index: 3, kind: output, shape index: {}]  }
   0x1 LB: > { %s837_s13 = sadd.s32 4294967295, %s1050_s12   ;;  %p841_p0 = scmp.ge.s32.totalorder %s1050_s12, 1  ;;  %s1050_s12 = sphi %s1072_s12, %s13_s12  }
   0x2   : > { %p138_p1 = scmp.lt.s32.totalorder %s1050_s12, 3 }
   0x4   : > { %p139_p2 = pnand %p841_p0, %p138_p1 }
   0x5   : > { %v1083_v0 = vld [vmem:[%s1240_s1] sm:$0xff] (!%p139_p2)   ;;  %s842_s16 = sshll.u32 (!%p139_p2), %s837_s13, 4  ;;  %v1088_v1 = vld [vmem:[%s1240_s1 + $0x8] sm:$0xff] (!%p139_p2)   ;;  %vm295_vm0 = vcmask (!%p139_p2), 261120  }
   0x6   : > { %142 = sbr.rel (%p139_p2) target bundleno = 303 (0x12f), region = 32  ;;  %p163_p3 = scmp.lt.s32.totalorder (!%p139_p2), %s842_s16, 31  ;;  %926 = vmatprep.subr.bf16.mxu0 (!%p139_p2), %v1083_v0  ;;  %906 = vmatprep.subr.bf16.mxu1 (!%p139_p2), %v1083_v0 }
   0x7   : > { %927 = vmatpush3.bf16.msra.mxu0 (!%p139_p2), %v1083_v0  ;;  %907 = vmatpush3.bf16.msra.mxu1 (!%p139_p2), %v1083_v0 }
   0x8   : > { %928 = vmatprep.subr.bf16.mxu0 (!%p139_p2), %v1088_v1  ;;  %908 = vmatprep.subr.bf16.mxu1 (!%p139_p2), %v1088_v1 }
   0xb   : > { %929 = vmatpush3.bf16.msra.mxu0 (!%p139_p2), %v1088_v1  ;;  %909 = vmatpush3.bf16.msra.mxu1 (!%p139_p2), %v1088_v1 }
   0xc   : > { %966 = vmatprep.subr.bf16.mxu1 (!%p139_p2), %v1083_v0  ;;  %946 = vmatprep.subr.bf16.mxu0 (!%p139_p2), %v1083_v0 }
   0xd   : > { %s1244_s16 = smov (!%p163_p3, %s842_s16), 31 }
   0xe   : > { %s843_s19 = sshll.u32 %s1244_s16, 3 }
   0xf   : > { %s1104_s22 = scalar_lea.vmem %s1239_s0, %s843_s19  ;;  %s1202_s29 = scalar_lea.vmem %s1242_s3, %s843_s19 }
  0x10   : > { %v175_v2 = vld [vmem:[%s1104_s22] sm:$0xff]  ;;  %v176_v3 = vld [vmem:[%s1104_s22 + $0x8] sm:$0xff]  ;;  %v177_v4 = vld [vmem:[%s1104_s22 + $0x10] sm:$0xff] }
  0x11   : > { %v191_v5 = vpack.c.bf16 %v176_v3, %v175_v2  ;;  %v178_v6 = vld [vmem:[%s1104_s22 + $0x18] sm:$0xff]  ;;  %v179_v7 = vld [vmem:[%s1104_s22 + $0x20] sm:$0xff]  ;;  %v180_v8 = vld [vmem:[%s1104_s22 + $0x28] sm:$0xff] }
  0x12   : > { %v192_v9 = vpack.c.bf16 %v178_v6, %v177_v4  ;;  %v193_v10 = vpack.c.bf16 %v180_v8, %v179_v7  ;;  %v181_v11 = vld [vmem:[%s1104_s22 + $0x30] sm:$0xff]  ;;  %v182_v12 = vld [vmem:[%s1104_s22 + $0x38] sm:$0xff]  ;;  %v183_v20 = vld [vmem:[%s1104_s22 + $0x40] sm:$0xff] }
  0x13   : > { %930 = vmatprep.mubr.msk.bf16.mxu0 %vm295_vm0, %v191_v5  ;;  %v199_v13 = vunpack.c.l.bf16 %v191_v5  ;;  %v200_v14 = vunpack.c.h.bf16 %v191_v5  ;;  %v194_v15 = vpack.c.bf16 %v182_v12, %v181_v11  ;;  %v184_v21 = vld [vmem:[%s1104_s22 + $0x48] sm:$0xff]  ;;  %v185_v30 = vld [vmem:[%s1104_s22 + $0x50] sm:$0xff]  ;;  %v186_v31 = vld [vmem:[%s1104_s22 + $0x58] sm:$0xff] }
  0x14   : > { %931 = vmatmul.mubr.msk.bf16.vlgmr.msra.gmra.mrb[0].mxu0 %vm295_vm0, %v192_v9  ;;  %v201_v16 = vunpack.c.l.bf16 %v192_v9  ;;  %v202_v17 = vunpack.c.h.bf16 %v192_v9  ;;  %v203_v18 = vunpack.c.l.bf16 %v193_v10  ;;  %v204_v19 = vunpack.c.h.bf16 %v193_v10  ;;  %v187_v34 = vld [vmem:[%s1104_s22 + $0x60] sm:$0xff]  ;;  %v188_v35 = vld [vmem:[%s1104_s22 + $0x68] sm:$0xff] }
  0x15   : > { %v215_v22 = vsub.f32 %v175_v2, %v199_v13  ;;  %v216_v23 = vsub.f32 %v176_v3, %v200_v14  ;;  %947 = vmatpush3.bf16.msra.mxu0 %v1083_v0  ;;  %934 = vmatprep.mubr.msk.bf16.mxu0 %vm295_vm0, %v193_v10  ;;  %v205_v24 = vunpack.c.l.bf16 %v194_v15  ;;  %v206_v25 = vunpack.c.h.bf16 %v194_v15  ;;  %v190_v2 = vld [vmem:[%s1104_s22 + $0x78] sm:$0xff] }
  0x16   : > { %v217_v26 = vsub.f32 %v177_v4, %v201_v16  ;;  %v218_v27 = vsub.f32 %v178_v6, %v202_v17  ;;  %948 = vmatprep.subr.bf16.mxu0 %v1088_v1  ;;  %v219_v28 = vsub.f32 %v179_v7, %v203_v18  ;;  %v220_v29 = vsub.f32 %v180_v8, %v204_v19 }
  0x17   : > { %v231_v32 = vpack.c.bf16 %v216_v23, %v215_v22  ;;  %v1127_v33 = vpack.c.bf16 %v184_v21, %v183_v20  ;;  %v221_v38 = vsub.f32 %v181_v11, %v205_v24  ;;  %v222_v39 = vsub.f32 %v182_v12, %v206_v25 }
  0x18   : > { %v232_v36 = vpack.c.bf16 %v218_v27, %v217_v26  ;;  %v233_v37 = vpack.c.bf16 %v220_v29, %v219_v28  ;;  %v1134_v43 = vpack.c.bf16 %v186_v31, %v185_v30  ;;  %v1138_v47 = vpack.c.bf16 %v188_v35, %v187_v34 }
  0x19   : > { %v239_v40 = vunpack.c.l.bf16 %v231_v32  ;;  %v240_v41 = vunpack.c.h.bf16 %v231_v32  ;;  %910 = vmatprep.mubr.msk.bf16.mxu1 %vm295_vm0, %v231_v32  ;;  %949 = vmatpush3.bf16.msra.mxu0 %v1088_v1  ;;  %v207_v42 = vunpack.c.l.bf16 %v1127_v33  ;;  %v208_v46 = vunpack.c.h.bf16 %v1127_v33 }
  0x1a   : > { %v241_v44 = vunpack.c.l.bf16 %v232_v36  ;;  %v242_v45 = vunpack.c.h.bf16 %v232_v36  ;;  %911 = vmatmul.mubr.msk.bf16.vlgmr.msra.gmra.mrb[0].mxu1 %vm295_vm0, %v232_v36  ;;  %v243_v54 = vunpack.c.l.bf16 %v233_v37  ;;  %v244_v56 = vunpack.c.h.bf16 %v233_v37 }
  0x1b   : > { %v255_v48 = vsub.f32 %v215_v22, %v239_v40  ;;  %v256_v49 = vsub.f32 %v216_v23, %v240_v41  ;;  %968 = vmatpush3.bf16.msra.mxu1 %v1083_v0  ;;  %914 = vmatprep.mubr.msk.bf16.mxu1 %vm295_vm0, %v233_v37  ;;  %v223_v50 = vsub.f32 %v183_v20, %v207_v42  ;;  %v209_v58 = vunpack.c.l.bf16 %v1134_v43  ;;  %v189_v0 = vld [vmem:[%s1104_s22 + $0x70] sm:$0xff] }
  0x1c   : > { %v257_v51 = vsub.f32 %v217_v26, %v241_v44  ;;  %v258_v52 = vsub.f32 %v218_v27, %v242_v45  ;;  %935 = vmatmul.mubr.msk.bf16.gmra.mrb[4].mxu0 %vm295_vm0, %v194_v15  ;;  %v224_v53 = vsub.f32 %v184_v21, %v208_v46  ;;  %967 = vmatprep.subr.bf16.mxu1 %v1088_v1  ;;  %v210_v59 = vunpack.c.h.bf16 %v1134_v43 }
  0x1d   : > { %v271_v55 = vpack.c.bf16 %v256_v49, %v255_v48  ;;  %v234_v57 = vpack.c.bf16 %v222_v39, %v221_v38  ;;  %v259_v60 = vsub.f32 %v219_v28, %v243_v54  ;;  %v260_v62 = vsub.f32 %v220_v29, %v244_v56 }
  0x1e   : > { %v235_v61 = vpack.c.bf16 %v224_v53, %v223_v50  ;;  %v211_v63 = vunpack.c.l.bf16 %v1138_v47  ;;  %v272_v3 = vpack.c.bf16 %v258_v52, %v257_v51  ;;  %v212_v6 = vunpack.c.h.bf16 %v1138_v47  ;;  %v1174_v52 = vld [vmem:[%s1241_s2] ss:$0 sm:$0xff] }
  0x1f   : > { %950 = vmatprep.mubr.msk.bf16.mxu0 %vm295_vm0, %v271_v55  ;;  %969 = vmatpush3.bf16.msra.mxu1 %v1088_v1  ;;  %v245_v4 = vunpack.c.l.bf16 %v234_v57  ;;  %v246_v5 = vunpack.c.h.bf16 %v234_v57  ;;  %v273_v7 = vpack.c.bf16 %v260_v62, %v259_v60  ;;  %v225_v10 = vsub.f32 %v185_v30, %v209_v58 }
  0x20   : > { %v247_v8 = vunpack.c.l.bf16 %v235_v61  ;;  %v248_v9 = vunpack.c.h.bf16 %v235_v61  ;;  %v226_v11 = vsub.f32 %v186_v31, %v210_v59  ;;  %v198_v12 = vpack.c.bf16 %v190_v2, %v189_v0  ;;  %v1180_v59 = vld [vmem:[%s1241_s2 + $0x1] ss:$0 sm:$0xff] }
  0x21   : > { %v227_v1 = vsub.f32 %v187_v34, %v211_v63  ;;  %v228_v13 = vsub.f32 %v188_v35, %v212_v6  ;;  %v261_v14 = vsub.f32 %v221_v38, %v245_v4  ;;  %v262_v15 = vsub.f32 %v222_v39, %v246_v5 }
  0x22   : > { %915 = vmatmul.mubr.msk.bf16.gmra.mrb[4].mxu1 %vm295_vm0, %v234_v57  ;;  %v263_v16 = vsub.f32 %v223_v50, %v247_v8  ;;  %v264_v17 = vsub.f32 %v224_v53, %v248_v9  ;;  %v236_v18 = vpack.c.bf16 %v226_v11, %v225_v10  ;;  %v213_v19 = vunpack.c.l.bf16 %v198_v12 }
  0x23   : > { %918 = vmatprep.mubr.msk.bf16.mxu1 %vm295_vm0, %v235_v61  ;;  %v214_v20 = vunpack.c.h.bf16 %v198_v12  ;;  %v237_v21 = vpack.c.bf16 %v228_v13, %v227_v1  ;;  %v274_v22 = vpack.c.bf16 %v262_v15, %v261_v14 }
  0x24   : > { %951 = vmatmul.mubr.msk.bf16.vlgmr.msra.gmra.mrb[0].mxu0 %vm295_vm0, %v272_v3  ;;  %v249_v23 = vunpack.c.l.bf16 %v236_v18  ;;  %v250_v24 = vunpack.c.h.bf16 %v236_v18  ;;  %v275_v25 = vpack.c.bf16 %v264_v17, %v263_v16  ;;  %v229_v28 = vsub.f32 %v189_v0, %v213_v19 }
  0x25   : > { %954 = vmatprep.mubr.msk.bf16.mxu0 %vm295_vm0, %v273_v7  ;;  %v251_v26 = vunpack.c.l.bf16 %v237_v21  ;;  %v252_v27 = vunpack.c.h.bf16 %v237_v21  ;;  %v230_v29 = vsub.f32 %v190_v2, %v214_v20 }
  0x26   : > { %v265_v30 = vsub.f32 %v225_v10, %v249_v23  ;;  %v266_v31 = vsub.f32 %v226_v11, %v250_v24 }
  0x27   : > { %v267_v32 = vsub.f32 %v227_v1, %v251_v26  ;;  %v268_v34 = vsub.f32 %v228_v13, %v252_v27  ;;  %v238_v35 = vpack.c.bf16 %v230_v29, %v229_v28 }
  0x28   : > { %v276_v36 = vpack.c.bf16 %v266_v31, %v265_v30 }
  0x29   : > { %v253_v37 = vunpack.c.l.bf16 %v238_v35  ;;  %v254_v38 = vunpack.c.h.bf16 %v238_v35  ;;  %v277_v39 = vpack.c.bf16 %v268_v34, %v267_v32 }
  0x2a   : > { %919 = vmatmul.mubr.msk.bf16.gmra.mrb[8].mxu1 %vm295_vm0, %v236_v18 }
  0x2b   : > { %922 = vmatprep.mubr.msk.bf16.mxu1 %vm295_vm0, %v237_v21  ;;  %v269_v40 = vsub.f32 %v229_v28, %v253_v37  ;;  %v270_v41 = vsub.f32 %v230_v29, %v254_v38 }
  0x2c   : > { %955 = vmatmul.mubr.msk.bf16.gmra.mrb[4].mxu0 %vm295_vm0, %v274_v22 }
  0x2d   : > { %958 = vmatprep.mubr.msk.bf16.mxu0 %vm295_vm0, %v275_v25  ;;  %v278_v42 = vpack.c.bf16 %v270_v41, %v269_v40 }
  0x32   : > { %923 = vmatmul.mubr.msk.bf16.gmra.mrb[12].mxu1 %vm295_vm0, %v238_v35 }
  0x33   : > { %938 = vmatprep.mubr.msk.bf16.mxu1 %vm295_vm0, %v1127_v33 }
  0x34   : > { %959 = vmatmul.mubr.msk.bf16.gmra.mrb[8].mxu0 %vm295_vm0, %v276_v36 }
  0x35   : > { %962 = vmatprep.mubr.msk.bf16.mxu0 %vm295_vm0, %v277_v39 }
  0x3a   : > { %939 = vmatmul.mubr.msk.bf16.vlgmr.msra.gmra.mrb[8].mxu1 %vm295_vm0, %v1134_v43 }
  0x3b   : > { %942 = vmatprep.mubr.msk.bf16.mxu1 %vm295_vm0, %v1138_v47 }
  0x3c   : > { %963 = vmatmul.mubr.msk.bf16.gmra.mrb[12].mxu0 %vm295_vm0, %v278_v42 }
  0x42   : > { %943 = vmatmul.mubr.msk.bf16.gmra.mrb[12].mxu1 %vm295_vm0, %v198_v12 }
  0xed   : > { %v912_v44 = vpop.f32.mrb[0].mxu1 }
  0xee   : > { %v354_v45 = vpop.f32.mrb[1].mxu1 }
  0xef   : > { %v913_v33 = vpop.f32.mrb[2].mxu1 }
  0xf0   : > { %v357_v46 = vpop.f32.mrb[3].mxu1 }
  0xf5   : > { %v916_v48 = vpop.f32.mrb[4].mxu1 }
  0xf6   : > { %v370_v49 = vpop.f32.mrb[5].mxu1 }
  0xf7   : > { %v917_v50 = vpop.f32.mrb[6].mxu1  ;;  %v952_v51 = vpop.f32.mrb[0].mxu0 }
  0xf8   : > { %v970_v43 = vadd.f32 %v952_v51, %v912_v44  ;;  %v373_v53 = vpop.f32.mrb[7].mxu1  ;;  %v596_v47 = vpop.f32.mrb[1].mxu0 }
  0xf9   : > { %v971_v54 = vadd.f32 %v596_v47, %v354_v45  ;;  %v953_v55 = vpop.f32.mrb[2].mxu0 }
  0xfa   : > { %v683_v56 = vsub.f32 %v970_v43, %v1174_v52  ;;  %v972_v57 = vadd.f32 %v953_v55, %v913_v33  ;;  %v599_v58 = vpop.f32.mrb[3].mxu0 }
  0xfb   : > { %v681_v60 = vsub.f32 %v971_v54, %v1174_v52  ;;  %v973_v61 = vadd.f32 %v599_v58, %v357_v46 }
  0xfc   : > { %v699_v62 = vmul.f32 %v683_v56, %v683_v56  ;;  %v684_v63 = vsub.f32 %v972_v57, %v1174_v52 }
  0xfd   : > { %v697_v0 = vmul.f32 %v681_v60, %v681_v60  ;;  %v682_v2 = vsub.f32 %v973_v61, %v1174_v52 }
  0xfe   : > { %v719_v3 = vmul.f32 %v1180_v59, %v699_v62  ;;  %v700_v4 = vmul.f32 %v684_v63, %v684_v63 }
  0xff   : > { %v717_v5 = vmul.f32 %v1180_v59, %v697_v0  ;;  %v698_v6 = vmul.f32 %v682_v2, %v682_v2  ;;  %v956_v7 = vpop.f32.mrb[4].mxu0 }
 0x100   : > { %v737_v8 = vmul.f32 1.442695, %v719_v3  ;;  %v720_v9 = vmul.f32 %v1180_v59, %v700_v4  ;;  %v974_v10 = vadd.f32 %v956_v7, %v916_v48  ;;  %v612_v11 = vpop.f32.mrb[5].mxu0 }
 0x101   : > { %v733_v12 = vmul.f32 1.442695, %v717_v5  ;;  %v718_v1 = vmul.f32 %v1180_v59, %v698_v6  ;;  %v975_v13 = vadd.f32 %v612_v11, %v370_v49  ;;  %v957_v14 = vpop.f32.mrb[6].mxu0 }
 0x102   : > { %1012 = vpow2.f32 %v737_v8  ;;  %v739_v15 = vmul.f32 1.442695, %v720_v9  ;;  %v687_v16 = vsub.f32 %v974_v10, %v1174_v52  ;;  %v976_v17 = vadd.f32 %v957_v14, %v917_v50  ;;  %v615_v18 = vpop.f32.mrb[7].mxu0 }
 0x103   : > { %1014 = vpow2.f32 %v733_v12  ;;  %v735_v19 = vmul.f32 1.442695, %v718_v1  ;;  %v685_v20 = vsub.f32 %v975_v13, %v1174_v52  ;;  %v977_v21 = vadd.f32 %v615_v18, %v373_v53 }
 0x104   : > { %1016 = vpow2.f32 %v739_v15  ;;  %v703_v22 = vmul.f32 %v687_v16, %v687_v16  ;;  %v688_v23 = vsub.f32 %v976_v17, %v1174_v52 }
 0x105   : > { %1018 = vpow2.f32 %v735_v19  ;;  %v701_v24 = vmul.f32 %v685_v20, %v685_v20  ;;  %v686_v25 = vsub.f32 %v977_v21, %v1174_v52 }
 0x106   : > { %v723_v26 = vmul.f32 %v1180_v59, %v703_v22  ;;  %v704_v27 = vmul.f32 %v688_v23, %v688_v23 }
 0x107   : > { %v721_v28 = vmul.f32 %v1180_v59, %v701_v24  ;;  %v702_v29 = vmul.f32 %v686_v25, %v686_v25  ;;  %v960_v30 = vpop.f32.mrb[8].mxu0 }
 0x108   : > { %v745_v31 = vmul.f32 1.442695, %v723_v26  ;;  %v724_v32 = vmul.f32 %v1180_v59, %v704_v27  ;;  %v628_v34 = vpop.f32.mrb[9].mxu0 }
 0x109   : > { %v741_v35 = vmul.f32 1.442695, %v721_v28  ;;  %v722_v36 = vmul.f32 %v1180_v59, %v702_v29  ;;  %v961_v37 = vpop.f32.mrb[10].mxu0 }
 0x10a   : > { %1020 = vpow2.f32 %v745_v31  ;;  %v747_v38 = vmul.f32 1.442695, %v724_v32  ;;  %v631_v39 = vpop.f32.mrb[11].mxu0 }
 0x10b   : > { %1022 = vpow2.f32 %v741_v35  ;;  %v743_v40 = vmul.f32 1.442695, %v722_v36 }
 0x10c   : > { %v1013_v41 = vpop.eup %1012  ;;  %1024 = vpow2.f32 %v747_v38 }
 0x10d   : > { %v1015_v42 = vpop.eup %1014  ;;  %767 = vst [vmem:[%s1202_s29 + $0x10] sm:$0xff] %v1013_v41  ;;  %1026 = vpow2.f32 %v743_v40  ;;  %v940_v44 = vpop.f32.mrb[8].mxu1 }
 0x10e   : > { %v1017_v45 = vpop.eup %1016  ;;  %765 = vst [vmem:[%s1202_s29] sm:$0xff] %v1015_v42  ;;  %v978_v33 = vadd.f32 %v960_v30, %v940_v44  ;;  %v507_v46 = vpop.f32.mrb[9].mxu1 }
 0x10f   : > { %v1019_v48 = vpop.eup %1018  ;;  %768 = vst [vmem:[%s1202_s29 + $0x18] sm:$0xff] %v1017_v45  ;;  %v979_v49 = vadd.f32 %v628_v34, %v507_v46  ;;  %v941_v50 = vpop.f32.mrb[10].mxu1 }
 0x110   : > { %v964_v51 = vpop.f32.mrb[12].mxu0  ;;  %766 = vst [vmem:[%s1202_s29 + $0x8] sm:$0xff] %v1019_v48  ;;  %v691_v43 = vsub.f32 %v978_v33, %v1174_v52  ;;  %v980_v53 = vadd.f32 %v961_v37, %v941_v50  ;;  %v510_v47 = vpop.f32.mrb[11].mxu1 }
 0x111   : > { %v644_v54 = vpop.f32.mrb[13].mxu0  ;;  %v689_v55 = vsub.f32 %v979_v49, %v1174_v52  ;;  %v981_v56 = vadd.f32 %v631_v39, %v510_v47 }
 0x112   : > { %v965_v57 = vpop.f32.mrb[14].mxu0  ;;  %v707_v58 = vmul.f32 %v691_v43, %v691_v43  ;;  %v692_v60 = vsub.f32 %v980_v53, %v1174_v52 }
 0x113   : > { %v647_v61 = vpop.f32.mrb[15].mxu0  ;;  %v705_v62 = vmul.f32 %v689_v55, %v689_v55  ;;  %v690_v63 = vsub.f32 %v981_v56, %v1174_v52 }
 0x114   : > { %v1021_v0 = vpop.eup %1020  ;;  %v727_v2 = vmul.f32 %v1180_v59, %v707_v58  ;;  %v708_v3 = vmul.f32 %v692_v60, %v692_v60 }
 0x115   : > { %v1023_v4 = vpop.eup %1022  ;;  %771 = vst [vmem:[%s1202_s29 + $0x30] sm:$0xff] %v1021_v0  ;;  %v725_v5 = vmul.f32 %v1180_v59, %v705_v62  ;;  %v706_v6 = vmul.f32 %v690_v63, %v690_v63  ;;  %v944_v7 = vpop.f32.mrb[12].mxu1 }
 0x116   : > { %v1025_v8 = vpop.eup %1024  ;;  %769 = vst [vmem:[%s1202_s29 + $0x20] sm:$0xff] %v1023_v4  ;;  %v753_v9 = vmul.f32 1.442695, %v727_v2  ;;  %v728_v10 = vmul.f32 %v1180_v59, %v708_v3  ;;  %v982_v11 = vadd.f32 %v964_v51, %v944_v7  ;;  %v523_v12 = vpop.f32.mrb[13].mxu1 }
 0x117   : > { %v1027_v1 = vpop.eup %1026  ;;  %772 = vst [vmem:[%s1202_s29 + $0x38] sm:$0xff] %v1025_v8  ;;  %v749_v13 = vmul.f32 1.442695, %v725_v5  ;;  %v726_v14 = vmul.f32 %v1180_v59, %v706_v6  ;;  %v983_v15 = vadd.f32 %v644_v54, %v523_v12  ;;  %v945_v16 = vpop.f32.mrb[14].mxu1 }
 0x118   : > { %770 = vst [vmem:[%s1202_s29 + $0x28] sm:$0xff] %v1027_v1  ;;  %1028 = vpow2.f32 %v753_v9  ;;  %v755_v17 = vmul.f32 1.442695, %v728_v10  ;;  %v695_v18 = vsub.f32 %v982_v11, %v1174_v52  ;;  %v984_v19 = vadd.f32 %v965_v57, %v945_v16  ;;  %v526_v20 = vpop.f32.mrb[15].mxu1 }
 0x119   : > { %1030 = vpow2.f32 %v749_v13  ;;  %v751_v21 = vmul.f32 1.442695, %v726_v14  ;;  %v693_v22 = vsub.f32 %v983_v15, %v1174_v52  ;;  %v985_v23 = vadd.f32 %v647_v61, %v526_v20 }
 0x11a   : > { %1032 = vpow2.f32 %v755_v17  ;;  %v711_v24 = vmul.f32 %v695_v18, %v695_v18  ;;  %v696_v25 = vsub.f32 %v984_v19, %v1174_v52 }
 0x11b   : > { %1034 = vpow2.f32 %v751_v21  ;;  %v709_v26 = vmul.f32 %v693_v22, %v693_v22  ;;  %v694_v27 = vsub.f32 %v985_v23, %v1174_v52 }
 0x11c   : > { %v731_v28 = vmul.f32 %v1180_v59, %v711_v24  ;;  %v712_v29 = vmul.f32 %v696_v25, %v696_v25 }
 0x11d   : > { %v729_v30 = vmul.f32 %v1180_v59, %v709_v26  ;;  %v710_v31 = vmul.f32 %v694_v27, %v694_v27 }
 0x11e   : > { %v761_v32 = vmul.f32 1.442695, %v731_v28  ;;  %v732_v34 = vmul.f32 %v1180_v59, %v712_v29 }
 0x11f   : > { %v757_v35 = vmul.f32 1.442695, %v729_v30  ;;  %v730_v36 = vmul.f32 %v1180_v59, %v710_v31 }
 0x120   : > { %1036 = vpow2.f32 %v761_v32  ;;  %v763_v37 = vmul.f32 1.442695, %v732_v34 }
 0x121   : > { %1038 = vpow2.f32 %v757_v35  ;;  %v759_v52 = vmul.f32 1.442695, %v730_v36 }
 0x122   : > { %v1029_v38 = vpop.eup %1028  ;;  %1040 = vpow2.f32 %v763_v37 }
 0x123   : > { %v1031_v39 = vpop.eup %1030  ;;  %775 = vst [vmem:[%s1202_s29 + $0x50] sm:$0xff] %v1029_v38  ;;  %1042 = vpow2.f32 %v759_v52 }
 0x124   : > { %v1033_v40 = vpop.eup %1032  ;;  %773 = vst [vmem:[%s1202_s29 + $0x40] sm:$0xff] %v1031_v39 }
 0x125   : > { %v1035_v41 = vpop.eup %1034  ;;  %776 = vst [vmem:[%s1202_s29 + $0x58] sm:$0xff] %v1033_v40 }
 0x126   : > { %774 = vst [vmem:[%s1202_s29 + $0x48] sm:$0xff] %v1035_v41 }
 0x12a   : > { %v1037_v42 = vpop.eup %1036 }
 0x12b   : > { %v1039_v59 = vpop.eup %1038  ;;  %779 = vst [vmem:[%s1202_s29 + $0x70] sm:$0xff] %v1037_v42 }
 0x12c   : > { %v1041_v44 = vpop.eup %1040  ;;  %777 = vst [vmem:[%s1202_s29 + $0x60] sm:$0xff] %v1039_v59 }
 0x12d   : > { %v1043_v45 = vpop.eup %1042  ;;  %780 = vst [vmem:[%s1202_s29 + $0x78] sm:$0xff] %v1041_v44 }
 0x12e   : > { %778 = vst [vmem:[%s1202_s29 + $0x68] sm:$0xff] %v1043_v45 }
 0x12f PF: > { %s13_s12 = sadd.s32 1, %s1050_s12  }
 0x130   : > { %p10_p4 = scmp.ge.s32.totalorder %s13_s12, 4  }
 0x132   :  { %12 = sbr.rel (!%p10_p4) target bundleno = 1 (0x1), region = 62 }

</bundles_post_ra>
